<compile_context>
chip_gen: v6e
topology: v6e:2x2x1
jax: 0.10.0
libtpu: 0.0.40
codegen_flags: <defaults>
</compile_context>

<pallas_src>
import jax
import jax.numpy as jnp
from jax.experimental import pallas as pl
from jax.experimental.pallas import tpu as pltpu

EPS = 1e-5        # torch BatchNorm1d default eps
DROP_P = 0.5      # torch Dropout default in the module
LANE = 128


def _ff_block(h_in, w, params, drop_mask):
    """Linear -> ReLU -> BatchNorm1d(train) -> Dropout.
    params is (3, H): row 0 = bias, row 1 = gamma, row 2 = beta.
    drop_mask is (N, H) with values in {0, 1/(1-p)} (pre-scaled)."""
    h = jnp.dot(h_in, w, preferred_element_type=jnp.float32) + params[0:1, :]
    h = jnp.maximum(h, 0.0)                              # ReLU
    mean = jnp.mean(h, axis=0, keepdims=True)            # BN batch stats
    hc = h - mean                                        # reuse centered tensor
    var = jnp.mean(hc * hc, axis=0, keepdims=True)       # biased variance
    y = params[1:2, :] * hc * jax.lax.rsqrt(var + EPS) + params[2:3, :]
    return y * drop_mask                                 # Dropout (training)


def model_kernel(x_ref, mask_ref,
                 w_in_ref, p_in_ref,
                 w_h1_ref, p_h1_ref,
                 w_h2_ref, p_h2_ref,
                 w_out_ref, b_out_ref,
                 o_ref):
    x = x_ref[...]
    h = _ff_block(x, w_in_ref[...], p_in_ref[...], mask_ref[0])        # in_layer
    h = _ff_block(h, w_h1_ref[...], p_h1_ref[...], mask_ref[1]) + h    # hidden_layer1 + residual
    h = _ff_block(h, w_h2_ref[...], p_h2_ref[...], mask_ref[2]) + h    # hidden_layer2 + residual
    # out_layer: plain Linear (no activation / BN / dropout), lane-padded width
    o_ref[...] = (jnp.dot(h, w_out_ref[...], preferred_element_type=jnp.float32)
                  + b_out_ref[...])


def fully_connected_model(x, params, drop_key):
    """x: [N, input_dim] f32.
    params: dict with torch-layout tensors:
      'in' : (w [H, Din], b [H], gamma [H], beta [H])
      'h1' : (w [H, H],   b [H], gamma [H], beta [H])
      'h2' : (w [H, H],   b [H], gamma [H], beta [H])
      'out': (w [Dout, H], b [Dout])
    drop_key: jax PRNG key for the three dropout masks (training mode)."""
    n, din = x.shape
    w_in, b_in, g_in, be_in = params['in']
    w_h1, b_h1, g_h1, be_h1 = params['h1']
    w_h2, b_h2, g_h2, be_h2 = params['h2']
    w_out, b_out = params['out']
    hdim = w_in.shape[0]
    dout = w_out.shape[0]
    dout_pad = ((dout + LANE - 1) // LANE) * LANE   # lane-dense output width

    # ---- glue (plain JAX): transpose weights, pack per-layer 1-D params ----
    wt_in = w_in.T.astype(jnp.float32)                              # (Din, H)
    wt_h1 = w_h1.T.astype(jnp.float32)                              # (H, H)
    wt_h2 = w_h2.T.astype(jnp.float32)                              # (H, H)
    p_in = jnp.stack([b_in, g_in, be_in]).astype(jnp.float32)       # (3, H)
    p_h1 = jnp.stack([b_h1, g_h1, be_h1]).astype(jnp.float32)       # (3, H)
    p_h2 = jnp.stack([b_h2, g_h2, be_h2]).astype(jnp.float32)       # (3, H)
    wt_out = jnp.zeros((hdim, dout_pad), jnp.float32).at[:, :dout].set(
        w_out.T.astype(jnp.float32))                                # (H, 128k)
    b_out_p = jnp.zeros((1, dout_pad), jnp.float32).at[:, :dout].set(
        b_out.astype(jnp.float32))                                  # (1, 128k)

    # Dropout masks (training), drawn with jax.random outside the kernel and
    # pre-scaled by 1/(1-p).  (pltpu.prng_* has no interpret/CPU lowering.)
    # TODO(synk): cannot bit-match torch's RNG stream for the dropout mask.
    keep = jax.random.bernoulli(drop_key, 1.0 - DROP_P, (3, n, hdim))
    masks = keep.astype(jnp.float32) * (1.0 / (1.0 - DROP_P))       # (3, N, H)

    out_pad = pl.pallas_call(
        model_kernel,
        out_shape=jax.ShapeDtypeStruct((n, dout_pad), jnp.float32),
        grid=(1,),
        in_specs=[
            pl.BlockSpec((n, din), lambda i: (0, 0)),
            pl.BlockSpec((3, n, hdim), lambda i: (0, 0, 0)),
            pl.BlockSpec((din, hdim), lambda i: (0, 0)),
            pl.BlockSpec((3, hdim), lambda i: (0, 0)),
            pl.BlockSpec((hdim, hdim), lambda i: (0, 0)),
            pl.BlockSpec((3, hdim), lambda i: (0, 0)),
            pl.BlockSpec((hdim, hdim), lambda i: (0, 0)),
            pl.BlockSpec((3, hdim), lambda i: (0, 0)),
            pl.BlockSpec((hdim, dout_pad), lambda i: (0, 0)),
            pl.BlockSpec((1, dout_pad), lambda i: (0, 0)),
        ],
        out_specs=pl.BlockSpec((n, dout_pad), lambda i: (0, 0)),
        compiler_params=pltpu.CompilerParams(
            dimension_semantics=("arbitrary",)),
    )(x.astype(jnp.float32), masks,
      wt_in, p_in, wt_h1, p_h1, wt_h2, p_h2, wt_out, b_out_p)

    return out_pad[:, :dout]   # slice lane padding back to output_dim


if __name__ == "__main__":
    # FullyConnectedModel(input_dim=16, hidden_dim=32, output_dim=8, n_layers=3)
    N, INPUT_DIM, HIDDEN_DIM, OUTPUT_DIM = 8, 16, 32, 8

    key = jax.random.PRNGKey(0)
    kx, kdrop, *kp = jax.random.split(key, 2 + 8)

    def linear_init(kw, kb, fan_out, fan_in):
        # torch nn.Linear default init: U(-1/sqrt(fan_in), 1/sqrt(fan_in))
        bound = 1.0 / (fan_in ** 0.5)
        w = jax.random.uniform(kw, (fan_out, fan_in), jnp.float32, -bound, bound)
        b = jax.random.uniform(kb, (fan_out,), jnp.float32, -bound, bound)
        return w, b

    w_in, b_in = linear_init(kp[0], kp[1], HIDDEN_DIM, INPUT_DIM)
    w_h1, b_h1 = linear_init(kp[2], kp[3], HIDDEN_DIM, HIDDEN_DIM)
    w_h2, b_h2 = linear_init(kp[4], kp[5], HIDDEN_DIM, HIDDEN_DIM)
    w_out, b_out = linear_init(kp[6], kp[7], OUTPUT_DIM, HIDDEN_DIM)
    ones = jnp.ones((HIDDEN_DIM,), jnp.float32)    # BatchNorm1d gamma default
    zeros = jnp.zeros((HIDDEN_DIM,), jnp.float32)  # BatchNorm1d beta default

    params = {
        'in': (w_in, b_in, ones, zeros),
        'h1': (w_h1, b_h1, ones, zeros),
        'h2': (w_h2, b_h2, ones, zeros),
        'out': (w_out, b_out),
    }

    x = jax.random.normal(kx, (N, INPUT_DIM), dtype=jnp.float32)

    out = fully_connected_model(x, params, kdrop)
    jax.block_until_ready(out)
    assert out.shape == (N, OUTPUT_DIM) and out.dtype == jnp.float32
    assert bool(jnp.isfinite(out).all())
    print("KERNEL_OK")
</pallas_src>

<mosaic_0001>
module attributes {stable_mosaic.version = 11 : i64} {
  func.func @model_kernel(%arg0: i32, %arg1: memref<8x16xf32, #tpu.memory_space<vmem>>, %arg2: memref<3x8x32xf32, #tpu.memory_space<vmem>>, %arg3: memref<16x32xf32, #tpu.memory_space<vmem>>, %arg4: memref<3x32xf32, #tpu.memory_space<vmem>>, %arg5: memref<32x32xf32, #tpu.memory_space<vmem>>, %arg6: memref<3x32xf32, #tpu.memory_space<vmem>>, %arg7: memref<32x32xf32, #tpu.memory_space<vmem>>, %arg8: memref<3x32xf32, #tpu.memory_space<vmem>>, %arg9: memref<32x128xf32, #tpu.memory_space<vmem>>, %arg10: memref<1x128xf32, #tpu.memory_space<vmem>>, %arg11: memref<8x128xf32, #tpu.memory_space<vmem>>) attributes {dimension_semantics = [#tpu.dimension_semantics<arbitrary>], iteration_bounds = array<i64: 1>, scalar_prefetch = 0 : i64, scratch_operands = 0 : i64, tpu.core_type = #tpu.core_type<tc>, window_params = [{pipeline_mode = #tpu.pipeline_mode<synchronous>, transform_indices = @transform_0, window_bounds = array<i64: 8, 16>}, {pipeline_mode = #tpu.pipeline_mode<synchronous>, transform_indices = @transform_1, window_bounds = array<i64: 3, 8, 32>}, {pipeline_mode = #tpu.pipeline_mode<synchronous>, transform_indices = @transform_2, window_bounds = array<i64: 16, 32>}, {pipeline_mode = #tpu.pipeline_mode<synchronous>, transform_indices = @transform_3, window_bounds = array<i64: 3, 32>}, {pipeline_mode = #tpu.pipeline_mode<synchronous>, transform_indices = @transform_4, window_bounds = array<i64: 32, 32>}, {pipeline_mode = #tpu.pipeline_mode<synchronous>, transform_indices = @transform_5, window_bounds = array<i64: 3, 32>}, {pipeline_mode = #tpu.pipeline_mode<synchronous>, transform_indices = @transform_6, window_bounds = array<i64: 32, 32>}, {pipeline_mode = #tpu.pipeline_mode<synchronous>, transform_indices = @transform_7, window_bounds = array<i64: 3, 32>}, {pipeline_mode = #tpu.pipeline_mode<synchronous>, transform_indices = @transform_8, window_bounds = array<i64: 32, 128>}, {pipeline_mode = #tpu.pipeline_mode<synchronous>, transform_indices = @transform_9, window_bounds = array<i64: 1, 128>}, {pipeline_mode = #tpu.pipeline_mode<synchronous>, transform_indices = @transform_10, window_bounds = array<i64: 8, 128>}]} {
    %c0 = arith.constant 0 : index
    %c0_0 = arith.constant 0 : index
    %0 = vector.load %arg1[%c0, %c0_0] : memref<8x16xf32, #tpu.memory_space<vmem>>, vector<8x16xf32>
    %c0_1 = arith.constant 0 : index
    %c0_2 = arith.constant 0 : index
    %1 = vector.load %arg3[%c0_1, %c0_2] : memref<16x32xf32, #tpu.memory_space<vmem>>, vector<16x32xf32>
    %c0_3 = arith.constant 0 : index
    %c0_4 = arith.constant 0 : index
    %2 = vector.load %arg4[%c0_3, %c0_4] : memref<3x32xf32, #tpu.memory_space<vmem>>, vector<3x32xf32>
    %c0_5 = arith.constant 0 : index
    %c0_6 = arith.constant 0 : index
    %c0_7 = arith.constant 0 : index
    %3 = vector.load %arg2[%c0_5, %c0_6, %c0_7] : memref<3x8x32xf32, #tpu.memory_space<vmem>>, vector<1x8x32xf32>
    %4 = vector.shape_cast %3 : vector<1x8x32xf32> to vector<8x32xf32>
    %cst = arith.constant dense<0.000000e+00> : vector<8x32xf32>
    %5 = tpu.matmul %0, %1, %cst {dimension_numbers = #tpu.dot_dimension_numbers<[1], [0], [0], [1], [0, 0, 1, 1], [], []>} : vector<8x16xf32>, vector<16x32xf32>, vector<8x32xf32> -> vector<8x32xf32>
    %6 = vector.extract_strided_slice %2 {offsets = [0, 0], sizes = [1, 32], strides = [1, 1]} : vector<3x32xf32> to vector<1x32xf32>
    %7 = vector.broadcast %6 : vector<1x32xf32> to vector<8x32xf32>
    %8 = arith.addf %5, %7 : vector<8x32xf32>
    %cst_8 = arith.constant 0.000000e+00 : f32
    %9 = vector.broadcast %cst_8 : f32 to vector<8x32xf32>
    %10 = arith.maximumf %8, %9 : vector<8x32xf32>
    %cst_9 = arith.constant dense<0.000000e+00> : vector<32xf32>
    %11 = vector.multi_reduction <add>, %10, %cst_9 [0] : vector<8x32xf32> to vector<32xf32>
    %12 = vector.shape_cast %11 : vector<32xf32> to vector<1x32xf32>
    %cst_10 = arith.constant 8.000000e+00 : f32
    %13 = vector.broadcast %cst_10 : f32 to vector<1x32xf32>
    %14 = arith.divf %12, %13 : vector<1x32xf32>
    %15 = vector.broadcast %14 : vector<1x32xf32> to vector<8x32xf32>
    %16 = arith.subf %10, %15 : vector<8x32xf32>
    %17 = arith.mulf %16, %16 : vector<8x32xf32>
    %cst_11 = arith.constant dense<0.000000e+00> : vector<32xf32>
    %18 = vector.multi_reduction <add>, %17, %cst_11 [0] : vector<8x32xf32> to vector<32xf32>
    %19 = vector.shape_cast %18 : vector<32xf32> to vector<1x32xf32>
    %cst_12 = arith.constant 8.000000e+00 : f32
    %20 = vector.broadcast %cst_12 : f32 to vector<1x32xf32>
    %21 = arith.divf %19, %20 : vector<1x32xf32>
    %22 = vector.extract_strided_slice %2 {offsets = [1, 0], sizes = [1, 32], strides = [1, 1]} : vector<3x32xf32> to vector<1x32xf32>
    %23 = vector.broadcast %22 : vector<1x32xf32> to vector<8x32xf32>
    %24 = arith.mulf %23, %16 : vector<8x32xf32>
    %cst_13 = arith.constant 9.99999974E-6 : f32
    %25 = vector.broadcast %cst_13 : f32 to vector<1x32xf32>
    %26 = arith.addf %21, %25 : vector<1x32xf32>
    %27 = math.rsqrt %26 : vector<1x32xf32>
    %28 = vector.broadcast %27 : vector<1x32xf32> to vector<8x32xf32>
    %29 = arith.mulf %24, %28 : vector<8x32xf32>
    %30 = vector.extract_strided_slice %2 {offsets = [2, 0], sizes = [1, 32], strides = [1, 1]} : vector<3x32xf32> to vector<1x32xf32>
    %31 = vector.broadcast %30 : vector<1x32xf32> to vector<8x32xf32>
    %32 = arith.addf %29, %31 : vector<8x32xf32>
    %33 = arith.mulf %32, %4 : vector<8x32xf32>
    %c0_14 = arith.constant 0 : index
    %c0_15 = arith.constant 0 : index
    %34 = vector.load %arg5[%c0_14, %c0_15] : memref<32x32xf32, #tpu.memory_space<vmem>>, vector<32x32xf32>
    %c0_16 = arith.constant 0 : index
    %c0_17 = arith.constant 0 : index
    %35 = vector.load %arg6[%c0_16, %c0_17] : memref<3x32xf32, #tpu.memory_space<vmem>>, vector<3x32xf32>
    %c1 = arith.constant 1 : index
    %c0_18 = arith.constant 0 : index
    %c0_19 = arith.constant 0 : index
    %36 = vector.load %arg2[%c1, %c0_18, %c0_19] : memref<3x8x32xf32, #tpu.memory_space<vmem>>, vector<1x8x32xf32>
    %37 = vector.shape_cast %36 : vector<1x8x32xf32> to vector<8x32xf32>
    %cst_20 = arith.constant dense<0.000000e+00> : vector<8x32xf32>
    %38 = tpu.matmul %33, %34, %cst_20 {dimension_numbers = #tpu.dot_dimension_numbers<[1], [0], [0], [1], [0, 0, 1, 1], [], []>} : vector<8x32xf32>, vector<32x32xf32>, vector<8x32xf32> -> vector<8x32xf32>
    %39 = vector.extract_strided_slice %35 {offsets = [0, 0], sizes = [1, 32], strides = [1, 1]} : vector<3x32xf32> to vector<1x32xf32>
    %40 = vector.broadcast %39 : vector<1x32xf32> to vector<8x32xf32>
    %41 = arith.addf %38, %40 : vector<8x32xf32>
    %cst_21 = arith.constant 0.000000e+00 : f32
    %42 = vector.broadcast %cst_21 : f32 to vector<8x32xf32>
    %43 = arith.maximumf %41, %42 : vector<8x32xf32>
    %cst_22 = arith.constant dense<0.000000e+00> : vector<32xf32>
    %44 = vector.multi_reduction <add>, %43, %cst_22 [0] : vector<8x32xf32> to vector<32xf32>
    %45 = vector.shape_cast %44 : vector<32xf32> to vector<1x32xf32>
    %cst_23 = arith.constant 8.000000e+00 : f32
    %46 = vector.broadcast %cst_23 : f32 to vector<1x32xf32>
    %47 = arith.divf %45, %46 : vector<1x32xf32>
    %48 = vector.broadcast %47 : vector<1x32xf32> to vector<8x32xf32>
    %49 = arith.subf %43, %48 : vector<8x32xf32>
    %50 = arith.mulf %49, %49 : vector<8x32xf32>
    %cst_24 = arith.constant dense<0.000000e+00> : vector<32xf32>
    %51 = vector.multi_reduction <add>, %50, %cst_24 [0] : vector<8x32xf32> to vector<32xf32>
    %52 = vector.shape_cast %51 : vector<32xf32> to vector<1x32xf32>
    %cst_25 = arith.constant 8.000000e+00 : f32
    %53 = vector.broadcast %cst_25 : f32 to vector<1x32xf32>
    %54 = arith.divf %52, %53 : vector<1x32xf32>
    %55 = vector.extract_strided_slice %35 {offsets = [1, 0], sizes = [1, 32], strides = [1, 1]} : vector<3x32xf32> to vector<1x32xf32>
    %56 = vector.broadcast %55 : vector<1x32xf32> to vector<8x32xf32>
    %57 = arith.mulf %56, %49 : vector<8x32xf32>
    %cst_26 = arith.constant 9.99999974E-6 : f32
    %58 = vector.broadcast %cst_26 : f32 to vector<1x32xf32>
    %59 = arith.addf %54, %58 : vector<1x32xf32>
    %60 = math.rsqrt %59 : vector<1x32xf32>
    %61 = vector.broadcast %60 : vector<1x32xf32> to vector<8x32xf32>
    %62 = arith.mulf %57, %61 : vector<8x32xf32>
    %63 = vector.extract_strided_slice %35 {offsets = [2, 0], sizes = [1, 32], strides = [1, 1]} : vector<3x32xf32> to vector<1x32xf32>
    %64 = vector.broadcast %63 : vector<1x32xf32> to vector<8x32xf32>
    %65 = arith.addf %62, %64 : vector<8x32xf32>
    %66 = arith.mulf %65, %37 : vector<8x32xf32>
    %67 = arith.addf %66, %33 : vector<8x32xf32>
    %c0_27 = arith.constant 0 : index
    %c0_28 = arith.constant 0 : index
    %68 = vector.load %arg7[%c0_27, %c0_28] : memref<32x32xf32, #tpu.memory_space<vmem>>, vector<32x32xf32>
    %c0_29 = arith.constant 0 : index
    %c0_30 = arith.constant 0 : index
    %69 = vector.load %arg8[%c0_29, %c0_30] : memref<3x32xf32, #tpu.memory_space<vmem>>, vector<3x32xf32>
    %c2 = arith.constant 2 : index
    %c0_31 = arith.constant 0 : index
    %c0_32 = arith.constant 0 : index
    %70 = vector.load %arg2[%c2, %c0_31, %c0_32] : memref<3x8x32xf32, #tpu.memory_space<vmem>>, vector<1x8x32xf32>
    %71 = vector.shape_cast %70 : vector<1x8x32xf32> to vector<8x32xf32>
    %cst_33 = arith.constant dense<0.000000e+00> : vector<8x32xf32>
    %72 = tpu.matmul %67, %68, %cst_33 {dimension_numbers = #tpu.dot_dimension_numbers<[1], [0], [0], [1], [0, 0, 1, 1], [], []>} : vector<8x32xf32>, vector<32x32xf32>, vector<8x32xf32> -> vector<8x32xf32>
    %73 = vector.extract_strided_slice %69 {offsets = [0, 0], sizes = [1, 32], strides = [1, 1]} : vector<3x32xf32> to vector<1x32xf32>
    %74 = vector.broadcast %73 : vector<1x32xf32> to vector<8x32xf32>
    %75 = arith.addf %72, %74 : vector<8x32xf32>
    %cst_34 = arith.constant 0.000000e+00 : f32
    %76 = vector.broadcast %cst_34 : f32 to vector<8x32xf32>
    %77 = arith.maximumf %75, %76 : vector<8x32xf32>
    %cst_35 = arith.constant dense<0.000000e+00> : vector<32xf32>
    %78 = vector.multi_reduction <add>, %77, %cst_35 [0] : vector<8x32xf32> to vector<32xf32>
    %79 = vector.shape_cast %78 : vector<32xf32> to vector<1x32xf32>
    %cst_36 = arith.constant 8.000000e+00 : f32
    %80 = vector.broadcast %cst_36 : f32 to vector<1x32xf32>
    %81 = arith.divf %79, %80 : vector<1x32xf32>
    %82 = vector.broadcast %81 : vector<1x32xf32> to vector<8x32xf32>
    %83 = arith.subf %77, %82 : vector<8x32xf32>
    %84 = arith.mulf %83, %83 : vector<8x32xf32>
    %cst_37 = arith.constant dense<0.000000e+00> : vector<32xf32>
    %85 = vector.multi_reduction <add>, %84, %cst_37 [0] : vector<8x32xf32> to vector<32xf32>
    %86 = vector.shape_cast %85 : vector<32xf32> to vector<1x32xf32>
    %cst_38 = arith.constant 8.000000e+00 : f32
    %87 = vector.broadcast %cst_38 : f32 to vector<1x32xf32>
    %88 = arith.divf %86, %87 : vector<1x32xf32>
    %89 = vector.extract_strided_slice %69 {offsets = [1, 0], sizes = [1, 32], strides = [1, 1]} : vector<3x32xf32> to vector<1x32xf32>
    %90 = vector.broadcast %89 : vector<1x32xf32> to vector<8x32xf32>
    %91 = arith.mulf %90, %83 : vector<8x32xf32>
    %cst_39 = arith.constant 9.99999974E-6 : f32
    %92 = vector.broadcast %cst_39 : f32 to vector<1x32xf32>
    %93 = arith.addf %88, %92 : vector<1x32xf32>
    %94 = math.rsqrt %93 : vector<1x32xf32>
    %95 = vector.broadcast %94 : vector<1x32xf32> to vector<8x32xf32>
    %96 = arith.mulf %91, %95 : vector<8x32xf32>
    %97 = vector.extract_strided_slice %69 {offsets = [2, 0], sizes = [1, 32], strides = [1, 1]} : vector<3x32xf32> to vector<1x32xf32>
    %98 = vector.broadcast %97 : vector<1x32xf32> to vector<8x32xf32>
    %99 = arith.addf %96, %98 : vector<8x32xf32>
    %100 = arith.mulf %99, %71 : vector<8x32xf32>
    %101 = arith.addf %100, %67 : vector<8x32xf32>
    %c0_40 = arith.constant 0 : index
    %c0_41 = arith.constant 0 : index
    %102 = vector.load %arg9[%c0_40, %c0_41] : memref<32x128xf32, #tpu.memory_space<vmem>>, vector<32x128xf32>
    %cst_42 = arith.constant dense<0.000000e+00> : vector<8x128xf32>
    %103 = tpu.matmul %101, %102, %cst_42 {dimension_numbers = #tpu.dot_dimension_numbers<[1], [0], [0], [1], [0, 0, 1, 1], [], []>} : vector<8x32xf32>, vector<32x128xf32>, vector<8x128xf32> -> vector<8x128xf32>
    %c0_43 = arith.constant 0 : index
    %c0_44 = arith.constant 0 : index
    %104 = vector.load %arg10[%c0_43, %c0_44] : memref<1x128xf32, #tpu.memory_space<vmem>>, vector<1x128xf32>
    %105 = vector.broadcast %104 : vector<1x128xf32> to vector<8x128xf32>
    %106 = arith.addf %103, %105 : vector<8x128xf32>
    %c0_45 = arith.constant 0 : index
    %c0_46 = arith.constant 0 : index
    %107 = vector.load %arg11[%c0_45, %c0_46] : memref<8x128xf32, #tpu.memory_space<vmem>>, vector<8x128xf32>
    tpu.vector_store %arg11[%c0_45, %c0_46], %106 {strides = array<i32>} : memref<8x128xf32, #tpu.memory_space<vmem>>, vector<8x128xf32>,
    return
  }
  func.func @transform_0(%arg0: i32) -> (i32, i32) {
    %c0_i32 = arith.constant 0 : i32
    %c0_i32_0 = arith.constant 0 : i32
    %c0_i32_1 = arith.constant 0 : i32
    return %c0_i32, %c0_i32_0 : i32, i32
  }
  func.func @transform_1(%arg0: i32) -> (i32, i32, i32) {
    %c0_i32 = arith.constant 0 : i32
    %c0_i32_0 = arith.constant 0 : i32
    %c0_i32_1 = arith.constant 0 : i32
    %c0_i32_2 = arith.constant 0 : i32
    return %c0_i32, %c0_i32_0, %c0_i32_1 : i32, i32, i32
  }
  func.func @transform_2(%arg0: i32) -> (i32, i32) {
    %c0_i32 = arith.constant 0 : i32
    %c0_i32_0 = arith.constant 0 : i32
    %c0_i32_1 = arith.constant 0 : i32
    return %c0_i32, %c0_i32_0 : i32, i32
  }
  func.func @transform_3(%arg0: i32) -> (i32, i32) {
    %c0_i32 = arith.constant 0 : i32
    %c0_i32_0 = arith.constant 0 : i32
    %c0_i32_1 = arith.constant 0 : i32
    return %c0_i32, %c0_i32_0 : i32, i32
  }
  func.func @transform_4(%arg0: i32) -> (i32, i32) {
    %c0_i32 = arith.constant 0 : i32
    %c0_i32_0 = arith.constant 0 : i32
    %c0_i32_1 = arith.constant 0 : i32
    return %c0_i32, %c0_i32_0 : i32, i32
  }
  func.func @transform_5(%arg0: i32) -> (i32, i32) {
    %c0_i32 = arith.constant 0 : i32
    %c0_i32_0 = arith.constant 0 : i32
    %c0_i32_1 = arith.constant 0 : i32
    return %c0_i32, %c0_i32_0 : i32, i32
  }
  func.func @transform_6(%arg0: i32) -> (i32, i32) {
    %c0_i32 = arith.constant 0 : i32
    %c0_i32_0 = arith.constant 0 : i32
    %c0_i32_1 = arith.constant 0 : i32
    return %c0_i32, %c0_i32_0 : i32, i32
  }
  func.func @transform_7(%arg0: i32) -> (i32, i32) {
    %c0_i32 = arith.constant 0 : i32
    %c0_i32_0 = arith.constant 0 : i32
    %c0_i32_1 = arith.constant 0 : i32
    return %c0_i32, %c0_i32_0 : i32, i32
  }
  func.func @transform_8(%arg0: i32) -> (i32, i32) {
    %c0_i32 = arith.constant 0 : i32
    %c0_i32_0 = arith.constant 0 : i32
    %c0_i32_1 = arith.constant 0 : i32
    return %c0_i32, %c0_i32_0 : i32, i32
  }
  func.func @transform_9(%arg0: i32) -> (i32, i32) {
    %c0_i32 = arith.constant 0 : i32
    %c0_i32_0 = arith.constant 0 : i32
    %c0_i32_1 = arith.constant 0 : i32
    return %c0_i32, %c0_i32_0 : i32, i32
  }
  func.func @transform_10(%arg0: i32) -> (i32, i32) {
    %c0_i32 = arith.constant 0 : i32
    %c0_i32_0 = arith.constant 0 : i32
    %c0_i32_1 = arith.constant 0 : i32
    return %c0_i32, %c0_i32_0 : i32, i32
  }
}

</mosaic_0001>

<bundles_post_ra>
// kernel: tpu_custom_call.1
= control target key start
LH: loop header
LB: loop body
LE: loop exit
PB: predicated region body
PF: predicated region fallthrough
CT: control target
= control target key end

     0   :  { %15 = vsyncpa [#allocation3], 0  ;;  %s963_s0 = inlined_call_operand.hbm [shape: f32[8,16], index: 0, kind: input, shape index: {}]   ;;  %s964_s1 = inlined_call_operand.hbm [shape: f32[3,8,32], index: 1, kind: input, shape index: {}]   ;;  %s965_s2 = inlined_call_operand.hbm [shape: f32[16,32], index: 2, kind: input, shape index: {}]   ;;  %s966_s3 = inlined_call_operand.vmem [shape: f32[3,32], index: 3, kind: input, shape index: {}]   ;;  %s967_s4 = inlined_call_operand.hbm [shape: f32[32,32], index: 4, kind: input, shape index: {}]   ;;  %s968_s5 = inlined_call_operand.vmem [shape: f32[3,32], index: 5, kind: input, shape index: {}]   ;;  %s969_s6 = inlined_call_operand.hbm [shape: f32[32,32], index: 6, kind: input, shape index: {}]   ;;  %s970_s7 = inlined_call_operand.vmem [shape: f32[3,32], index: 7, kind: input, shape index: {}]   ;;  %s971_s8 = inlined_call_operand.hbm [shape: f32[32,128], index: 8, kind: input, shape index: {}]   ;;  %s972_s9 = inlined_call_operand.vmem [shape: f32[1,128], index: 9, kind: input, shape index: {}]   ;;  %s973_s10 = inlined_call_operand.hbm [shape: f32[8,128], index: 10, kind: output, shape index: {}]  }
   0x1   :  { %16 = vsyncpa [#allocation6], 0 }
   0x2   :  { %17 = vsyncpa [#allocation9], 0 }
   0x3   :  { %18 = vsyncpa [#allocation12], 0 }
   0x4   :  { %19 = vsyncpa [#allocation4], 0  ;;  %s803_s13 = smov [#allocation5]  }
   0x5   :  { %s35_s14 = sshll.u32 %s803_s13, 4  ;;  %s36_s14 = int_to_ptr.vmem [resolvable:$true] %s35_s14 }
   0x6   :  { %s661_s15 = scalar_lea.vmem %s36_s14, 384  ;;  %p666_p1 = scmp.lt.s32.totalorder %s36_s14, %s36_s14 }
   0x7   :  { %p662_p0 = scmp.ne.s32.totalorder %s36_s14, %s661_s15  ;;  %p667_p2 = scmp.lt.s32.totalorder %s661_s15, %s661_s15 }
   0x9   :  { %p668_p3 = por %p667_p2, %p666_p1 }
   0xb   :  { %p669_p4 = pnand %p668_p3, %p662_p0 }
   0xd   :  { %672 = shalt.err (!%p669_p4)
}
   0xe   :  { %s804_s16 = smov 128   ;;  %s805_s17 = smov 8  }
   0xf   :  { %41 = dma.hbm_to_vmem [thread:$0]  %s964_s1, 384, %s36_s14, [#allocation6], %s804_s16, %s804_s16, %s805_s17  }
  0x10   :  { %s806_s20 = smov [#allocation8]   ;;  %s807_s22 = smov [#allocation2]  }
  0x11   :  { %s61_s21 = sshll.u32 %s806_s20, 4  ;;  %s26_s23 = sshll.u32 %s807_s22, 4  ;;  %s62_s21 = int_to_ptr.vmem [resolvable:$true] %s61_s21  ;;  %s27_s23 = int_to_ptr.vmem [resolvable:$true] %s26_s23 }
  0x12   :  { %s681_s24 = scalar_lea.vmem %s62_s21, 512  ;;  %p686_p6 = scmp.lt.s32.totalorder %s62_s21, %s62_s21 }
  0x13   :  { %p682_p5 = scmp.ne.s32.totalorder %s62_s21, %s681_s24  ;;  %p687_p7 = scmp.lt.s32.totalorder %s681_s24, %s681_s24 }
  0x15   :  { %p688_p8 = por %p687_p7, %p686_p6 }
  0x17   :  { %p689_p9 = pnand %p688_p8, %p682_p5 }
  0x19   :  { %692 = shalt.err (!%p689_p9)
}
  0x1a   :  { %67 = dma.hbm_to_vmem [thread:$0]  %s967_s4, 512, %s62_s21, [#allocation9], %s804_s16, %s804_s16, %s805_s17  }
  0x1b   :  { %s701_s1 = scalar_lea.vmem %s27_s23, 128  ;;  %p706_p11 = scmp.lt.s32.totalorder %s27_s23, %s27_s23 }
  0x1c   :  { %p702_p10 = scmp.ne.s32.totalorder %s27_s23, %s701_s1  ;;  %p707_p12 = scmp.lt.s32.totalorder %s701_s1, %s701_s1 }
  0x1e   :  { %p708_p13 = por %p707_p12, %p706_p11 }
  0x20   :  { %p709_p0 = pnand %p708_p13, %p702_p10 }
  0x22   :  { %712 = shalt.err (!%p709_p0)
}
  0x23   :  { %29 = dma.hbm_to_vmem [thread:$0]  %s963_s0, 128, %s27_s23, [#allocation3]  }
  0x24   :  { %s808_s29 = smov [#allocation7]   ;;  %s809_s11 = smov [#allocation10]  }
  0x25   :  { %s47_s30 = sshll.u32 %s808_s29, 4  ;;  %s75_s12 = sshll.u32 %s809_s11, 4  ;;  %s48_s30 = int_to_ptr.vmem [resolvable:$true] %s47_s30  ;;  %s76_s12 = int_to_ptr.vmem [resolvable:$true] %s75_s12 }
  0x26   :  { %s721_s13 = scalar_lea.vmem %s48_s30, 256  ;;  %p726_p2 = scmp.lt.s32.totalorder %s48_s30, %s48_s30 }
  0x27   :  { %p722_p1 = scmp.ne.s32.totalorder %s48_s30, %s721_s13  ;;  %p727_p3 = scmp.lt.s32.totalorder %s721_s13, %s721_s13 }
  0x29   :  { %p728_p4 = por %p727_p3, %p726_p2 }
  0x2b   :  { %p729_p5 = pnand %p728_p4, %p722_p1 }
  0x2d   :  { %732 = shalt.err (!%p729_p5)
}
  0x2e   :  { %53 = dma.hbm_to_vmem [thread:$0]  %s965_s2, 256, %s48_s30, [#allocation6], %s804_s16, %s804_s16, %s805_s17  }
  0x2f   :  { %s741_s0 = scalar_lea.vmem %s76_s12, 512  ;;  %p746_p7 = scmp.lt.s32.totalorder %s76_s12, %s76_s12 }
  0x30   :  { %p742_p6 = scmp.ne.s32.totalorder %s76_s12, %s741_s0  ;;  %p747_p8 = scmp.lt.s32.totalorder %s741_s0, %s741_s0 }
  0x32   :  { %p748_p9 = por %p747_p8, %p746_p7 }
  0x34   :  { %p749_p10 = pnand %p748_p9, %p742_p6 }
  0x36   :  { %752 = shalt.err (!%p749_p10)
}
  0x37   :  { %81 = dma.hbm_to_vmem [thread:$0]  %s969_s6, 512, %s76_s12, [#allocation9], %s804_s16, %s804_s16, %s805_s17  }
  0x38   :  { %s810_s19 = smov [#allocation11]  }
  0x39   :  { %s89_s20 = sshll.u32 %s810_s19, 4  ;;  %s90_s20 = int_to_ptr.vmem [resolvable:$true] %s89_s20 }
  0x3a   :  { %s761_s21 = scalar_lea.vmem %s90_s20, 512  ;;  %p766_p12 = scmp.lt.s32.totalorder %s90_s20, %s90_s20 }
  0x3b   :  { %p762_p11 = scmp.ne.s32.totalorder %s90_s20, %s761_s21  ;;  %p767_p13 = scmp.lt.s32.totalorder %s761_s21, %s761_s21 }
  0x3d   :  { %p768_p0 = por %p767_p13, %p766_p12 }
  0x3f   :  { %p769_p1 = pnand %p768_p0, %p762_p11 }
  0x41   :  { %772 = shalt.err (!%p769_p1)
}
  0x42   :  { %95 = dma.hbm_to_vmem [thread:$0]  %s971_s8, 512, %s90_s20, [#allocation12], %s804_s16, %s804_s16, %s805_s17  }
  0x43   :  { %793 = dma.done.wait [#allocation3], 128  }
  0x44   :  { %794 = vsyncadd [#allocation3], 4294967168 }
  0x45   :  { %795 = dma.done.wait [#allocation6], 640  }
  0x46   :  { %796 = vsyncadd [#allocation6], 4294966656 }
  0x47   :  { %797 = dma.done.wait [#allocation9], 1024  }
  0x48   :  { %798 = vsyncadd [#allocation9], 4294966272 }
  0x49   :  { %799 = dma.done.wait [#allocation12], 512  }
  0x4a   :  { %800 = vsyncadd [#allocation12], 4294966784  ;;  %v811_v0 = vmov 0.0   ;;  %vm812_vm0 = vmmov 0   ;;  %v118_v1 = vld [vmem:[#allocation7 + $0x8] sm:$0xff]  ;;  %v117_v2 = vld [vmem:[#allocation7] sm:$0xff]  ;;  %v121_v8 = vlaneseq }
  0x4b   :  { %596 = vmatprep.subr.mxu0 %v811_v0  ;;  %600 = vmatprep.mubr.msk.f32.mxu0 %vm812_vm0, %v811_v0  ;;  %v116_v3 = vld [vmem:[#allocation2] sm:$0xff]  ;;  %vm125_vm1 = vcmask 130048   ;;  %v237_v4 = vld [vmem:[#allocation8 + $0x18] sm:$0xff]  ;;  %v235_v6 = vld [vmem:[#allocation8 + $0x8] sm:$0xff]  ;;  %vm200_vm2 = vcmask 261120   ;;  %s813_s24 = smov [#allocation13]  }
  0x4c   :  { %603 = vmatprep.subr.mxu1 %v811_v0  ;;  %611 = vmatprep.mubr.msk.f32.mxu1 %vm812_vm0, %v811_v0  ;;  %v236_v5 = vld [vmem:[#allocation8 + $0x10] sm:$0xff]  ;;  %v234_v7 = vld [vmem:[#allocation8] sm:$0xff]  ;;  %v122_v9 = vshrl.u32 %v121_v8, 7  ;;  %v120_v43 = vld [vmem:[#allocation5] sm:$0xff]  ;;  %s561_s25 = sshll.u32 %s813_s24, 4  ;;  %s562_s25 = int_to_ptr.vmem [resolvable:$true] %s561_s25 }
  0x4d   :  { %597 = vmatpush3.msra.mxu0 %v118_v1  ;;  %604 = vmatpush3.msra.mxu1 %v237_v4  ;;  %v119_v11 = vld [vmem:[%s966_s3] sm:$0x7]  ;;  %v355_v46 = vld [vmem:[#allocation10 + $0x18] sm:$0xff]  ;;  %v353_v48 = vld [vmem:[#allocation10 + $0x8] sm:$0xff]  ;;  %s773_s26 = scalar_lea.vmem %s562_s25, 128  ;;  %p778_p3 = scmp.lt.s32.totalorder %s562_s25, %s562_s25 }
  0x4e   :  { %598 = vmatprep.subr.mxu0 %v811_v0  ;;  %605 = vmatprep.subr.mxu1 %v811_v0  ;;  %v916_v10 = vsub.s32 0, %v122_v9  ;;  %v924_v36 = vsub.s32 1, %v122_v9  ;;  %v927_v38 = vsub.s32 2, %v122_v9  ;;  %v354_v47 = vld [vmem:[#allocation10 + $0x10] sm:$0xff]  ;;  %v352_v49 = vld [vmem:[#allocation10] sm:$0xff]  ;;  %p774_p2 = scmp.ne.s32.totalorder %s562_s25, %s773_s26  ;;  %p779_p4 = scmp.lt.s32.totalorder %s773_s26, %s773_s26 }
  0x4f   :  { %599 = vmatpush3.msra.mxu0 %v117_v2  ;;  %606 = vmatpush3.msra.mxu1 %v236_v5  ;;  %v238_v50 = vld [vmem:[%s968_s5] sm:$0x7] }
  0x50   :  { %601 = vmatmul.mubr.msk.f32.vlgmr.msra.gmra.mxu0 %vm125_vm1, %v116_v3  ;;  %614 = vmatprep.subr.mxu0 %v811_v0  ;;  %v124_v12 = vrot.slane %v119_v11, %v916_v10  ;;  %v223_v37 = vrot.slane %v119_v11, %v924_v36  ;;  %v231_v40 = vrot.slane %v119_v11, %v927_v38  ;;  %p780_p5 = por %p779_p4, %p778_p3 }
  0x51   :  { %622 = vmatprep.mubr.msk.f32.mxu0 %vm812_vm0, %v811_v0  ;;  %607 = vmatprep.subr.mxu1 %v811_v0  ;;  %v244_v51 = vrot.slane %v238_v50, %v916_v10 }
  0x52   :  { %608 = vmatpush3.msra.mxu1 %v235_v6  ;;  %615 = vmatpush3.msra.mxu0 %v355_v46  ;;  %p781_p6 = pnand %p780_p5, %p774_p2 }
  0x53   :  { %609 = vmatprep.subr.mxu1 %v811_v0  ;;  %616 = vmatprep.subr.mxu0 %v811_v0 }
  0x54   :  { %610 = vmatpush3.msra.mxu1 %v234_v7  ;;  %617 = vmatpush3.msra.mxu0 %v354_v47 }
  0x55   :  { %625 = vmatprep.subr.mxu1 %v811_v0  ;;  %618 = vmatprep.subr.mxu0 %v811_v0 }
  0x56   :  { %619 = vmatpush3.msra.mxu0 %v353_v48 }
  0x57   :  { %620 = vmatprep.subr.mxu0 %v811_v0 }
  0x58   :  { %621 = vmatpush3.msra.mxu0 %v352_v49 }
 0x110   :  { %v195_v13 = vpop.f32.mrf.mxu0 }
 0x111   :  { %v196_v14 = vadd.f32 %v195_v13, %v124_v12  ;;  %v340_v13 = vrot.slane %v238_v50, %v924_v36 }
 0x112   :  { %v602_v15 = vpop.f32.mrf.mxu0 }
 0x113   :  { %v199_v16 = vmax.f32 %v196_v14, 0.0  ;;  %v348_v15 = vrot.slane %v238_v50, %v927_v38 }
 0x115   :  { %v201_v17 = vsel %vm200_vm2, %v199_v16, 0.0 }
 0x116   :  { %v202_v18 = vrot.slane %v201_v17, 4 }
 0x118   :  { %v203_v19 = vadd.f32 %v202_v18, %v201_v17  ;;  %v240_v18 = vld [vmem:[#allocation5 + $0x8] sm:$0xff] }
 0x11a   :  { %v204_v20 = vrot.slane %v203_v19, 2 }
 0x11c   :  { %v205_v21 = vadd.f32 %v204_v20, %v203_v19 }
 0x11e   :  { %v206_v22 = vrot.slane %v205_v21, 1 }
 0x120   :  { %v207_v23 = vadd.f32 %v206_v22, %v205_v21  ;;  %v473_v22 = vld [vmem:[#allocation11 + $0x18] sm:$0xff] }
 0x122   :  { %v209_v24 = vmul.f32 0.125, %v207_v23  ;;  %v472_v23 = vld [vmem:[#allocation11 + $0x10] sm:$0xff] }
 0x124   :  { %v210_v25 = vsub.f32 %v199_v16, %v209_v24  ;;  %v471_v24 = vld [vmem:[#allocation11 + $0x8] sm:$0xff] }
 0x126   :  { %v211_v26 = vmul.f32 %v210_v25, %v210_v25  ;;  %v224_v39 = vmul.f32 %v223_v37, %v210_v25  ;;  %v470_v25 = vld [vmem:[#allocation11] sm:$0xff] }
 0x128   :  { %v212_v27 = vsel %vm200_vm2, %v211_v26, 0.0  ;;  %v356_v26 = vld [vmem:[%s970_s7] sm:$0x7] }
 0x129   :  { %v213_v28 = vrot.slane %v212_v27, 4 }
 0x12b   :  { %v214_v29 = vadd.f32 %v213_v28, %v212_v27  ;;  %v362_v27 = vrot.slane %v356_v26, %v916_v10 }
 0x12d   :  { %v215_v30 = vrot.slane %v214_v29, 2 }
 0x12f   :  { %v216_v31 = vadd.f32 %v215_v30, %v214_v29 }
 0x131   :  { %v217_v32 = vrot.slane %v216_v31, 1 }
 0x133   :  { %v218_v33 = vadd.f32 %v217_v32, %v216_v31 }
 0x135   :  { %v219_v34 = vmul.f32 0.125, %v218_v33 }
 0x137   :  { %v225_v35 = vadd.f32 1e-05, %v219_v34 }
 0x139   :  { %647 = vrsqrt.f32 %v225_v35 }
 0x146   :  { %v648_v41 = vpop.eup %647 }
 0x147   :  { %v227_v42 = vmul.f32 %v648_v41, %v224_v39 }
 0x149   :  { %v232_v44 = vadd.f32 %v231_v40, %v227_v42 }
 0x14b   :  { %v233_v45 = vmul.f32 %v232_v44, %v120_v43 }
 0x14d   :  { %612 = vmatmul.mubr.msk.f32.vlgmr.msra.gmra.mxu1 %vm200_vm2, %v233_v45 }
 0x14e   :  { %633 = vmatprep.mubr.msk.f32.mxu1 %vm812_vm0, %v811_v0  ;;  %626 = vmatpush3.msra.mxu1 %v473_v22 }
 0x14f   :  { %627 = vmatprep.subr.mxu1 %v811_v0 }
 0x150   :  { %628 = vmatpush3.msra.mxu1 %v472_v23 }
 0x151   :  { %629 = vmatprep.subr.mxu1 %v811_v0 }
 0x152   :  { %630 = vmatpush3.msra.mxu1 %v471_v24 }
 0x153   :  { %631 = vmatprep.subr.mxu1 %v811_v0 }
 0x154   :  { %632 = vmatpush3.msra.mxu1 %v470_v25 }
 0x20d   :  { %v314_v52 = vpop.f32.mrf.mxu1 }
 0x20e   :  { %v315_v53 = vadd.f32 %v314_v52, %v244_v51  ;;  %v458_v51 = vrot.slane %v356_v26, %v924_v36 }
 0x20f   :  { %v613_v54 = vpop.f32.mrf.mxu1 }
 0x210   :  { %v318_v55 = vmax.f32 %v315_v53, 0.0  ;;  %v466_v53 = vrot.slane %v356_v26, %v927_v38 }
 0x212   :  { %v319_v56 = vsel %vm200_vm2, %v318_v55, 0.0 }
 0x213   :  { %v320_v57 = vrot.slane %v319_v56, 4 }
 0x215   :  { %v321_v58 = vadd.f32 %v320_v57, %v319_v56  ;;  %v358_v56 = vld [vmem:[#allocation5 + $0x10] sm:$0xff] }
 0x217   :  { %v322_v59 = vrot.slane %v321_v58, 2 }
 0x219   :  { %v323_v60 = vadd.f32 %v322_v59, %v321_v58 }
 0x21b   :  { %v324_v61 = vrot.slane %v323_v60, 1 }
 0x21d   :  { %v325_v62 = vadd.f32 %v324_v61, %v323_v60  ;;  %v576_v60 = vld [vmem:[%s972_s9] ss:$0 sm:$0xff] }
 0x21f   :  { %v326_v63 = vmul.f32 0.125, %v325_v62 }
 0x221   :  { %v327_v1 = vsub.f32 %v318_v55, %v326_v63 }
 0x223   :  { %v328_v2 = vmul.f32 %v327_v1, %v327_v1  ;;  %v341_v14 = vmul.f32 %v340_v13, %v327_v1 }
 0x225   :  { %v329_v3 = vsel %vm200_vm2, %v328_v2, 0.0 }
 0x226   :  { %v330_v4 = vrot.slane %v329_v3, 4 }
 0x228   :  { %v331_v5 = vadd.f32 %v330_v4, %v329_v3 }
 0x22a   :  { %v332_v6 = vrot.slane %v331_v5, 2 }
 0x22c   :  { %v333_v7 = vadd.f32 %v332_v6, %v331_v5 }
 0x22e   :  { %v334_v8 = vrot.slane %v333_v7, 1 }
 0x230   :  { %v335_v9 = vadd.f32 %v334_v8, %v333_v7 }
 0x232   :  { %v336_v11 = vmul.f32 0.125, %v335_v9 }
 0x234   :  { %v342_v12 = vadd.f32 1e-05, %v336_v11 }
 0x236   :  { %649 = vrsqrt.f32 %v342_v12 }
 0x243   :  { %v650_v16 = vpop.eup %649 }
 0x244   :  { %v344_v17 = vmul.f32 %v650_v16, %v341_v14 }
 0x246   :  { %v349_v19 = vadd.f32 %v348_v15, %v344_v17 }
 0x248   :  { %v350_v20 = vmul.f32 %v349_v19, %v240_v18 }
 0x24a   :  { %v351_v21 = vadd.f32 %v350_v20, %v233_v45 }
 0x24c   :  { %623 = vmatmul.mubr.msk.f32.vlgmr.msra.gmra.mxu0 %vm200_vm2, %v351_v21 }
 0x30c   :  { %v432_v28 = vpop.f32.mrf.mxu0 }
 0x30d   :  { %v433_v29 = vadd.f32 %v432_v28, %v362_v27 }
 0x30e   :  { %v624_v30 = vpop.f32.mrf.mxu0 }
 0x30f   :  { %v436_v31 = vmax.f32 %v433_v29, 0.0 }
 0x311   :  { %v437_v32 = vsel %vm200_vm2, %v436_v31, 0.0 }
 0x312   :  { %v438_v33 = vrot.slane %v437_v32, 4 }
 0x314   :  { %v439_v34 = vadd.f32 %v438_v33, %v437_v32 }
 0x316   :  { %v440_v35 = vrot.slane %v439_v34, 2 }
 0x318   :  { %v441_v37 = vadd.f32 %v440_v35, %v439_v34 }
 0x31a   :  { %v442_v39 = vrot.slane %v441_v37, 1 }
 0x31c   :  { %v443_v40 = vadd.f32 %v442_v39, %v441_v37 }
 0x31e   :  { %v444_v0 = vmul.f32 0.125, %v443_v40 }
 0x320   :  { %v445_v41 = vsub.f32 %v436_v31, %v444_v0 }
 0x322   :  { %v446_v42 = vmul.f32 %v445_v41, %v445_v41  ;;  %v459_v52 = vmul.f32 %v458_v51, %v445_v41 }
 0x324   :  { %v447_v43 = vsel %vm200_vm2, %v446_v42, 0.0 }
 0x325   :  { %v448_v44 = vrot.slane %v447_v43, 4 }
 0x327   :  { %v449_v45 = vadd.f32 %v448_v44, %v447_v43 }
 0x329   :  { %v450_v10 = vrot.slane %v449_v45, 2 }
 0x32b   :  { %v451_v46 = vadd.f32 %v450_v10, %v449_v45 }
 0x32d   :  { %v452_v47 = vrot.slane %v451_v46, 1 }
 0x32f   :  { %v453_v48 = vadd.f32 %v452_v47, %v451_v46 }
 0x331   :  { %v454_v49 = vmul.f32 0.125, %v453_v48 }
 0x333   :  { %v460_v50 = vadd.f32 1e-05, %v454_v49 }
 0x335   :  { %651 = vrsqrt.f32 %v460_v50 }
 0x342   :  { %v652_v54 = vpop.eup %651 }
 0x343   :  { %v462_v55 = vmul.f32 %v652_v54, %v459_v52 }
 0x345   :  { %v467_v57 = vadd.f32 %v466_v53, %v462_v55 }
 0x347   :  { %v468_v58 = vmul.f32 %v467_v57, %v358_v56 }
 0x349   :  { %v469_v59 = vadd.f32 %v468_v58, %v351_v21 }
 0x34b   :  { %634 = vmatmul.mubr.msk.f32.vlgmr.msra.gmra.mxu1 %vm200_vm2, %v469_v59 }
 0x40b   :  { %v550_v61 = vpop.f32.mrf.mxu1 }
 0x40c   :  { %v551_v62 = vadd.f32 %v576_v60, %v550_v61 }
 0x40d   :  { %v635_v36 = vpop.f32.mrf.mxu1 }
 0x40e   :  { %554 = vst [vmem:[#allocation13] sm:$0xff] %v551_v62 }
 0x40f   :  { %784 = shalt.err (!%p781_p6)
}
 0x410   :  { %564 = dma.vmem_to_hbm [thread:$0]  %s562_s25, 128, %s973_s10, [#allocation4]  }
 0x411   :  { %801 = dma.done.wait [#allocation4], 128  }
 0x412   :  { %802 = vsyncadd [#allocation4], 4294967168 }
 0x413   :  { %568 = vsyncpa [#allocation3], 1 }
 0x414   :  { %569 = vsyncpa [#allocation6], 1 }
 0x415   :  { %570 = vsyncpa [#allocation9], 1 }
 0x416   :  { %571 = vsyncpa [#allocation12], 1 }
 0x417   :  { %572 = vsyncpa [#allocation4], 1 }

</bundles_post_ra>
